<compile_context>
chip_gen: v7x
topology: tpu7x:2x2x1
jax: 0.10.0
libtpu: 0.0.40
codegen_flags: <defaults>
</compile_context>

<pallas_src>
import jax
import jax.numpy as jnp
from jax.experimental import pallas as pl
from jax.experimental.pallas import tpu as pltpu


def _es_pop_kernel(x_ref, w_in_ref, w_bd_ref, o_ref):
    """One (P-block, B-tile) step: fused linear -> relu -> logit-diff -> log_softmax.

    x_ref:    (4, b_tile)            shared observations, batch on the lane axis
    w_in_ref: (p_blk*16, 4)          folded input weights for this P block
    w_bd_ref: (1, p_blk, p_blk*16)   block-diag (W_out[0]-W_out[1]) for this P block
    o_ref:    (2, p_blk, b_tile)     [0] = log p(class 0), [1] = log p(class 1)
    """
    # Layer 1 for all p_blk members at once: (p_blk*16, 4) @ (4, b_tile).
    h = jnp.dot(w_in_ref[...], x_ref[...], preferred_element_type=jnp.float32)
    h = jnp.maximum(h, 0.0)                                        # (p_blk*16, b_tile)

    # d[p, b] = l0[p, b] - l1[p, b] via one block-diagonal matmul (K = p_blk*16).
    d = jnp.dot(w_bd_ref[0], h, preferred_element_type=jnp.float32)  # (p_blk, b_tile)

    # 2-class log_softmax in closed form with a stable softplus:
    #   log_p0 = -softplus(-d) = -(max(-d, 0) + log(1 + exp(-|d|)));  log_p1 = log_p0 - d
    common = jnp.log(1.0 + jnp.exp(-jnp.abs(d)))
    log_p0 = -(jnp.maximum(-d, 0.0) + common)
    log_p1 = log_p0 - d

    # Direct slice stores into the sublane/lane-dense output slab (no concat shuffle).
    o_ref[0] = log_p0.astype(o_ref.dtype)
    o_ref[1] = log_p1.astype(o_ref.dtype)


def es_population_forward(x, w_in_pop, w_out_pop, *, p_blk=None, b_tile=None):
    """Forward pass for a whole ES population.

    x:         (B, 4)       observations (PyTorch nn.Linear input convention)
    w_in_pop:  (P, 16, 4)   per-member `input` weights (PyTorch storage layout)
    w_out_pop: (P, 2, 16)   per-member `output` weights
    returns:   (P, B, 2)    log-probs per member == F.log_softmax(model(x), dim=1)
    """
    B, K = x.shape
    P, H, K2 = w_in_pop.shape
    Pc, C, H2 = w_out_pop.shape
    assert K == K2 and H == H2 and P == Pc
    assert C == 2, "closed-form log_softmax below is specific to 2 classes"

    # Population block size: 8 fills v5e's 128 MXU rows (M = p_blk*H = 128);
    # 16 fills v6e/v7x's 256 rows. Fall back to whatever keeps P % p_blk == 0.
    if p_blk is None:
        if P % 16 == 0:
            p_blk = 16
        elif P % 8 == 0:
            p_blk = 8
        else:
            p_blk = P
    assert P % p_blk == 0
    n_p = P // p_blk

    # Batch tile: lane axis a multiple of 128; larger tiles amortize per-step
    # overhead while keeping >=2 grid steps so both v7x TensorCores get work.
    if b_tile is None:
        if B % 512 == 0 and B > 512:
            b_tile = 512
        elif B % 128 == 0:
            b_tile = 128
        else:
            b_tile = B
    assert B % b_tile == 0
    n_b = B // b_tile

    f32 = jnp.float32
    # One-time layout plumbing in the wrapper (cheap XLA ops, outside the kernel).
    x_t = x.astype(f32).T                                            # (4, B)
    w_in_flat = w_in_pop.astype(f32).reshape(P * H, K)               # (P*16, 4)
    # 2-class log_softmax only needs d = l0 - l1 -> only W_out[0]-W_out[1] is used.
    w_diff = (w_out_pop[:, 0, :] - w_out_pop[:, 1, :]).astype(f32)   # (P, 16)
    # Per-P-block block-diagonal form so the kernel gets d with one MXU matmul:
    #   w_bd[g, i, j*H + n] = (i == j) * w_diff[g*p_blk + i, n]
    eye = jnp.eye(p_blk, dtype=f32)
    w_bd = (eye[None, :, :, None] * w_diff.reshape(n_p, p_blk, 1, H)
            ).reshape(n_p, p_blk, p_blk * H)

    out = pl.pallas_call(
        _es_pop_kernel,
        out_shape=jax.ShapeDtypeStruct((2, P, B), f32),
        grid=(n_p, n_b),
        in_specs=[
            pl.BlockSpec((K, b_tile), lambda pi, bi: (0, bi)),               # shared obs tile
            pl.BlockSpec((p_blk * H, K), lambda pi, bi: (pi, 0)),            # folded W_in block
            pl.BlockSpec((1, p_blk, p_blk * H), lambda pi, bi: (pi, 0, 0)),  # block-diag w_diff
        ],
        out_specs=pl.BlockSpec((2, p_blk, b_tile), lambda pi, bi: (0, pi, bi)),
        compiler_params=pltpu.CompilerParams(
            dimension_semantics=("parallel", "parallel"),
        ),
    )(x_t, w_in_flat, w_bd)

    # (2, P, B) -> (P, B, 2) to match the PyTorch (batch, classes) convention.
    return jnp.transpose(out, (1, 2, 0))


def es_model_forward(x, w_in, w_out):
    """Single-model convenience wrapper: matches ES_Model.forward exactly."""
    return es_population_forward(x, w_in[None], w_out[None])[0]


def reference_forward(x, w_in_pop, w_out_pop):
    """Pure-JAX reference, HIGHEST precision so it is f32-exact on TPU."""
    hp = jax.lax.Precision.HIGHEST
    h = jnp.maximum(jnp.einsum("bk,pnk->pbn", x, w_in_pop, precision=hp), 0.0)
    logits = jnp.einsum("pbn,pcn->pbc", h, w_out_pop, precision=hp)
    return jax.nn.log_softmax(logits, axis=-1)


if __name__ == "__main__":
    key = jax.random.PRNGKey(0)
    k_x, k_in, k_out = jax.random.split(key, 3)

    # Small deterministic shapes: obs dim 4 (cartpole), hidden 16, 2 actions.
    # B = 256 -> two lane-dense 128-wide batch tiles (2 parallel grid steps so both
    # v7x TensorCores get work); P = 8 -> M = p_blk*16 = 128 rows, one v5e MXU tile.
    B, P = 256, 8
    x = jax.random.normal(k_x, (B, 4), dtype=jnp.float32)

    # ES_Model.__init__ zeros the weights; emulate one mutate(sigma) step per member.
    # A modest sigma keeps logits O(1) so the float32 check is well conditioned
    # (the forward-pass semantics are identical for any sigma).
    sigma = 0.5
    w_in_pop = jnp.zeros((P, 16, 4), jnp.float32) + sigma * jax.random.normal(
        k_in, (P, 16, 4), jnp.float32)
    w_out_pop = jnp.zeros((P, 2, 16), jnp.float32) + sigma * jax.random.normal(
        k_out, (P, 2, 16), jnp.float32)

    log_probs = es_population_forward(x, w_in_pop, w_out_pop)
    jax.block_until_ready(log_probs)
    assert log_probs.shape == (P, B, 2)

    ref = reference_forward(x, w_in_pop, w_out_pop)
    # Tolerance leaves headroom for MXU f32 multi-pass vs XLA HIGHEST accumulation
    # differences; typical agreement is ~1e-6.
    max_err = float(jnp.max(jnp.abs(log_probs - ref)))
    assert jnp.allclose(log_probs, ref, rtol=2e-2, atol=2e-2), f"max abs err {max_err}"

    # Single-model path (P=1) matches the original ES_Model.forward signature.
    single = es_model_forward(x, w_in_pop[0], w_out_pop[0])
    jax.block_until_ready(single)
    assert jnp.allclose(single, ref[0], rtol=2e-2, atol=2e-2)

    print("KERNEL_OK")
</pallas_src>

<mosaic_0001>
module attributes {stable_mosaic.version = 11 : i64} {
  func.func @_es_pop_kernel(%arg0: i32, %arg1: i32, %arg2: memref<4x128xf32, #tpu.memory_space<vmem>>, %arg3: memref<128x4xf32, #tpu.memory_space<vmem>>, %arg4: memref<1x8x128xf32, #tpu.memory_space<vmem>>, %arg5: memref<2x8x128xf32, #tpu.memory_space<vmem>>) attributes {dimension_semantics = [#tpu.dimension_semantics<parallel>, #tpu.dimension_semantics<parallel>], iteration_bounds = array<i64: 1, 2>, scalar_prefetch = 0 : i64, scratch_operands = 0 : i64, tpu.core_type = #tpu.core_type<tc>, window_params = [{transform_indices = @transform_0, window_bounds = array<i64: 4, 128>}, {transform_indices = @transform_1, window_bounds = array<i64: 128, 4>}, {transform_indices = @transform_2, window_bounds = array<i64: 1, 8, 128>}, {transform_indices = @transform_3, window_bounds = array<i64: 2, 8, 128>}]} {
    %c0 = arith.constant 0 : index
    %c0_0 = arith.constant 0 : index
    %0 = vector.load %arg3[%c0, %c0_0] : memref<128x4xf32, #tpu.memory_space<vmem>>, vector<128x4xf32>
    %c0_1 = arith.constant 0 : index
    %c0_2 = arith.constant 0 : index
    %1 = vector.load %arg2[%c0_1, %c0_2] : memref<4x128xf32, #tpu.memory_space<vmem>>, vector<4x128xf32>
    %cst = arith.constant dense<0.000000e+00> : vector<128x128xf32>
    %2 = tpu.matmul %0, %1, %cst {dimension_numbers = #tpu.dot_dimension_numbers<[1], [0], [0], [1], [0, 0, 1, 1], [], []>} : vector<128x4xf32>, vector<4x128xf32>, vector<128x128xf32> -> vector<128x128xf32>
    %cst_3 = arith.constant 0.000000e+00 : f32
    %3 = vector.broadcast %cst_3 : f32 to vector<128x128xf32>
    %4 = arith.maximumf %2, %3 : vector<128x128xf32>
    %c0_4 = arith.constant 0 : index
    %c0_5 = arith.constant 0 : index
    %c0_6 = arith.constant 0 : index
    %5 = vector.load %arg4[%c0_4, %c0_5, %c0_6] : memref<1x8x128xf32, #tpu.memory_space<vmem>>, vector<1x8x128xf32>
    %6 = vector.shape_cast %5 : vector<1x8x128xf32> to vector<8x128xf32>
    %cst_7 = arith.constant dense<0.000000e+00> : vector<8x128xf32>
    %7 = tpu.matmul %6, %4, %cst_7 {dimension_numbers = #tpu.dot_dimension_numbers<[1], [0], [0], [1], [0, 0, 1, 1], [], []>} : vector<8x128xf32>, vector<128x128xf32>, vector<8x128xf32> -> vector<8x128xf32>
    %8 = math.absf %7 : vector<8x128xf32>
    %cst_8 = arith.constant 0.000000e+00 : f32
    %9 = vector.broadcast %cst_8 : f32 to vector<8x128xf32>
    %10 = arith.subf %9, %8 : vector<8x128xf32>
    %11 = math.exp %10 : vector<8x128xf32>
    %cst_9 = arith.constant 1.000000e+00 : f32
    %12 = vector.broadcast %cst_9 : f32 to vector<8x128xf32>
    %13 = arith.addf %12, %11 : vector<8x128xf32>
    %14 = math.log %13 : vector<8x128xf32>
    %cst_10 = arith.constant 0.000000e+00 : f32
    %15 = vector.broadcast %cst_10 : f32 to vector<8x128xf32>
    %16 = arith.subf %15, %7 : vector<8x128xf32>
    %cst_11 = arith.constant 0.000000e+00 : f32
    %17 = vector.broadcast %cst_11 : f32 to vector<8x128xf32>
    %18 = arith.maximumf %16, %17 : vector<8x128xf32>
    %19 = arith.addf %18, %14 : vector<8x128xf32>
    %cst_12 = arith.constant 0.000000e+00 : f32
    %20 = vector.broadcast %cst_12 : f32 to vector<8x128xf32>
    %21 = arith.subf %20, %19 : vector<8x128xf32>
    %22 = arith.subf %21, %7 : vector<8x128xf32>
    %c0_13 = arith.constant 0 : index
    %c0_14 = arith.constant 0 : index
    %c0_15 = arith.constant 0 : index
    %23 = vector.load %arg5[%c0_13, %c0_14, %c0_15] : memref<2x8x128xf32, #tpu.memory_space<vmem>>, vector<1x8x128xf32>
    %24 = vector.shape_cast %23 : vector<1x8x128xf32> to vector<8x128xf32>
    %25 = vector.shape_cast %21 : vector<8x128xf32> to vector<1x8x128xf32>
    tpu.vector_store %arg5[%c0_13, %c0_14, %c0_15], %25 {strides = array<i32>} : memref<2x8x128xf32, #tpu.memory_space<vmem>>, vector<1x8x128xf32>,
    %c1 = arith.constant 1 : index
    %c0_16 = arith.constant 0 : index
    %c0_17 = arith.constant 0 : index
    %26 = vector.load %arg5[%c1, %c0_16, %c0_17] : memref<2x8x128xf32, #tpu.memory_space<vmem>>, vector<1x8x128xf32>
    %27 = vector.shape_cast %26 : vector<1x8x128xf32> to vector<8x128xf32>
    %28 = vector.shape_cast %22 : vector<8x128xf32> to vector<1x8x128xf32>
    tpu.vector_store %arg5[%c1, %c0_16, %c0_17], %28 {strides = array<i32>} : memref<2x8x128xf32, #tpu.memory_space<vmem>>, vector<1x8x128xf32>,
    return
  }
  func.func @transform_0(%arg0: i32, %arg1: i32) -> (i32, i32) {
    %c0_i32 = arith.constant 0 : i32
    %c0_i32_0 = arith.constant 0 : i32
    return %c0_i32, %arg1 : i32, i32
  }
  func.func @transform_1(%arg0: i32, %arg1: i32) -> (i32, i32) {
    %c0_i32 = arith.constant 0 : i32
    %c0_i32_0 = arith.constant 0 : i32
    return %arg0, %c0_i32 : i32, i32
  }
  func.func @transform_2(%arg0: i32, %arg1: i32) -> (i32, i32, i32) {
    %c0_i32 = arith.constant 0 : i32
    %c0_i32_0 = arith.constant 0 : i32
    %c0_i32_1 = arith.constant 0 : i32
    return %arg0, %c0_i32, %c0_i32_0 : i32, i32, i32
  }
  func.func @transform_3(%arg0: i32, %arg1: i32) -> (i32, i32, i32) {
    %c0_i32 = arith.constant 0 : i32
    %c0_i32_0 = arith.constant 0 : i32
    return %c0_i32, %arg0, %arg1 : i32, i32, i32
  }
}

</mosaic_0001>

<bundles_post_ra>
// kernel: tpu_custom_call.1
= control target key start
LH: loop header
LB: loop body
LE: loop exit
PB: predicated region body
PF: predicated region fallthrough
CT: control target
= control target key end

     0   :  { %8 = vsyncpa [#allocation3], 0  ;;  %s1157_s0 = inlined_call_operand.vmem [shape: f32[4,256], index: 0, kind: input, shape index: {}]   ;;  %s1158_s1 = inlined_call_operand.vmem [shape: f32[128,4], index: 1, kind: input, shape index: {}]   ;;  %s1159_s2 = inlined_call_operand.vmem [shape: f32[1,8,128], index: 2, kind: input, shape index: {}]   ;;  %s1160_s3 = inlined_call_operand.hbm [shape: f32[2,8,256], index: 3, kind: output, shape index: {}]  }
   0x1   :  { %10 = vsyncpa [#allocation3 + $0x1], 0  ;;  %s975_s12 = smov 0   ;;  %s977_s13 = smov 0  }
   0x2   :  { %s979_s14 = smov 0   ;;  %s981_s15 = smov 0  }
   0x3   :  { %s983_s16 = smov 0   ;;  %s985_s17 = smov 0  }
   0x4 LB: > { %s653_s18 = sadd.s32 4294967295, %s946_s17   ;;  %s654_s19 = sadd.s32 4294967294, %s946_s17   ;;  %s946_s17 = sphi %s985_s17, %s16_s17   ;;  %s942_s16 = sphi %s983_s16, %s1167_s16   ;;  %s938_s15 = sphi %s981_s15, %s1166_s15   ;;  %s934_s14 = sphi %s979_s14, %s1165_s14   ;;  %s930_s13 = sphi %s977_s13, %s1164_s13   ;;  %s926_s12 = sphi %s975_s12, %s1163_s12  }
   0x5   : > { %s25_s20 = sadd.s32 1, %s942_s16  ;;  %s115_s21 = sadd.s32 1, %s934_s14 }
   0x6   : > { %p26_p0 = scmp.ge.s32.totalorder %s25_s20, 2  ;;  %p125_p1 = scmp.ne.s32.totalorder %s934_s14, %s930_s13 }
   0x7   : > { %p126_p2 = scmp.eq.s32.totalorder %s653_s18, 1  ;;  %p131_p3 = scmp.ne.s32.totalorder %s930_s13, %s926_s12 }
   0x8   : > { %s1169_s20 = smov (%p26_p0, %s25_s20), 0  ;;  %p132_p5 = scmp.eq.s32.totalorder %s654_s19, 1 }
   0x9   : > { %p1015_p4 = por %p126_p2, %p125_p1  ;;  %s111_s23 = ssub.s32 %s942_s16, %s1169_s20 }
   0xa   : > { %p659_p6 = scmp.ge.s32.totalorder %s946_s17, 1  ;;  %p113_p7 = scmp.eq.s32.totalorder %s111_s23, 0 }
   0xb   : > { %p1022_p8 = por %p132_p5, %p131_p3  ;;  %p173_p9 = scmp.lt.s32.totalorder %s946_s17, 3 }
   0xc   : > { %s1028_s25 = scalar_select %p113_p7, %s934_s14, %s115_s21  }
   0xd   : > { %p174_p10 = pnand %p659_p6, %p173_p9 }
   0xe   : > { %p205_p11 = scmp.lt.s32.totalorder (!%p174_p10), %s938_s15, 1  ;;  %v219_v0 = vld [vmem:[%s1158_s1] sm:$0xff] (!%p174_p10)  ;;  %vm236_vm0 = vcmask (!%p174_p10), 31744   ;;  %vm285_vm1 = vcmask (!%p174_p10), 1043456   ;;  %v220_v2 = vld [vmem:[%s1158_s1 + $0x8] sm:$0xff] (!%p174_p10)  ;;  %v221_v3 = vld [vmem:[%s1158_s1 + $0x10] sm:$0xff] (!%p174_p10) }
   0xf   : > { %177 = sbr.rel (%p174_p10) target bundleno = 543 (0x21f), region = 32  ;;  %720 = vmatprep.mubr.msk.f32.mxu0 (!%p174_p10), %vm236_vm0, %v219_v0  ;;  %v222_v4 = vld [vmem:[%s1158_s1 + $0x18] sm:$0xff] (!%p174_p10)  ;;  %v223_v5 = vld [vmem:[%s1158_s1 + $0x20] sm:$0xff] (!%p174_p10)  ;;  %v224_v6 = vld [vmem:[%s1158_s1 + $0x28] sm:$0xff] (!%p174_p10)  ;;  %v948_v17 = vmov (!%p174_p10), 0.0|0.0   ;;  %vm949_vm2 = vmmov (!%p174_p10), 0  }
  0x10   : > { %v225_v7 = vld [vmem:[%s1158_s1 + $0x30] sm:$0xff] (!%p174_p10)  ;;  %v226_v8 = vld [vmem:[%s1158_s1 + $0x38] sm:$0xff] (!%p174_p10)  ;;  %v227_v9 = vld [vmem:[%s1158_s1 + $0x40] sm:$0xff] (!%p174_p10)  ;;  %779 = vmatprep.subr.bf16.mxu1 (!%p174_p10), %v948_v17  ;;  %v950_v18 = vmov (!%p174_p10), 0.0   ;;  %s202_s4 = sand.u32 (!%p174_p10), 1, %s930_s13   ;;  %s681_s8 = sshll.u32 (!%p174_p10), %s938_s15, 7 }
  0x11   : > { %v228_v10 = vld [vmem:[%s1158_s1 + $0x48] sm:$0xff] (!%p174_p10)  ;;  %v229_v11 = vld [vmem:[%s1158_s1 + $0x50] sm:$0xff] (!%p174_p10)  ;;  %v230_v12 = vld [vmem:[%s1158_s1 + $0x58] sm:$0xff] (!%p174_p10)  ;;  %776 = vmatprep.mubr.msk.f32.mxu1 (!%p174_p10), %vm949_vm2, %v950_v18  ;;  %s1109_s11 = scalar_lea.hbm (!%p174_p10), %s1160_s3, %s681_s8  ;;  %s1111_s18 = scalar_lea.sflag (!%p174_p10), [#allocation3], %s202_s4 }
  0x12   : > { %v231_v13 = vld [vmem:[%s1158_s1 + $0x60] sm:$0xff] (!%p174_p10)  ;;  %v232_v14 = vld [vmem:[%s1158_s1 + $0x68] sm:$0xff] (!%p174_p10)  ;;  %v233_v15 = vld [vmem:[%s1158_s1 + $0x70] sm:$0xff] (!%p174_p10) }
  0x13   : > { %v234_v16 = vld [vmem:[%s1158_s1 + $0x78] sm:$0xff] (!%p174_p10)  ;;  %v450_v59 = vld [vmem:[%s1159_s2] sm:$0xff] (!%p174_p10) }
  0x16   : > { %s206_s28 = scalar_select %p205_p11, %s938_s15, 1 }
  0x17   : > { %s951_s15 = smov [#allocation2]  }
  0x18   : > { %s661_s29 = sshll.u32 %s206_s28, 2  ;;  %s872_s21 = sshll.u32 %s951_s15, 4  ;;  %s873_s21 = int_to_ptr.vmem [resolvable:$false] %s872_s21 }
  0x19   : > { %s208_s5 = scalar_lea.vmem %s1157_s0, %s661_s29  ;;  %s874_s23 = scalar_lea.vmem %s873_s21, 512 }
  0x1a   : > { %v235_v1 = vld [vmem:[%s208_s5] sm:$0xf]  ;;  %s660_s5 = sshll.u32 %s202_s4, 4 }
  0x1b   : > { %718 = vmatprep.subr.msk.mxu0 %vm285_vm1, %v235_v1  ;;  %s204_s6 = scalar_lea.vmem [#allocation2], %s660_s5 }
  0x1c   : > { %719 = vmatpush3.msk.msra.mxu0 %vm285_vm1, %v235_v1  ;;  %s551_s7 = sshll.u32 %s204_s6, 4  ;;  %s1104_s7 = int_to_ptr.vmem [resolvable:$true] %s551_s7 }
  0x1d   : > { %721 = vmatmul.mubr.msk.f32.vlgmr.msra.gmra.mrb[0].mxu0 %vm236_vm0, %v220_v2  ;;  %s868_s19 = scalar_lea.vmem %s1104_s7, 256  ;;  %p875_p1 = scmp.lt.s32.totalorder %s1104_s7, %s873_s21 }
  0x1e   : > { %723 = vmatprep.mubr.msk.f32.mxu0 %vm236_vm0, %v221_v3  ;;  %p869_p12 = scmp.ne.s32.totalorder %s1104_s7, %s868_s19  ;;  %p876_p2 = scmp.lt.s32.totalorder %s874_s23, %s868_s19 }
  0x20   : > { %p870_p13 = pnand %p869_p12, %p1015_p4  ;;  %p877_p3 = por %p876_p2, %p875_p1 }
  0x21   : > { %724 = vmatmul.mubr.msk.f32.gmra.mrb[2].mxu0 %vm236_vm0, %v222_v4 }
  0x22   : > { %726 = vmatprep.mubr.msk.f32.mxu0 %vm236_vm0, %v223_v5  ;;  %p871_p0 = pneg %p870_p13 }
  0x24   : > { %p878_p5 = pnand %p877_p3, %p871_p0 }
  0x25   : > { %727 = vmatmul.mubr.msk.f32.gmra.mrb[4].mxu0 %vm236_vm0, %v224_v6 }
  0x26   : > { %729 = vmatprep.mubr.msk.f32.mxu0 %vm236_vm0, %v225_v7 }
  0x29   : > { %730 = vmatmul.mubr.msk.f32.gmra.mrb[6].mxu0 %vm236_vm0, %v226_v8 }
  0x2a   : > { %732 = vmatprep.mubr.msk.f32.mxu0 %vm236_vm0, %v227_v9 }
  0x2d   : > { %733 = vmatmul.mubr.msk.f32.gmra.mrb[8].mxu0 %vm236_vm0, %v228_v10 }
  0x2e   : > { %735 = vmatprep.mubr.msk.f32.mxu0 %vm236_vm0, %v229_v11 }
  0x31   : > { %736 = vmatmul.mubr.msk.f32.gmra.mrb[10].mxu0 %vm236_vm0, %v230_v12 }
  0x32   : > { %738 = vmatprep.mubr.msk.f32.mxu0 %vm236_vm0, %v231_v13 }
  0x35   : > { %739 = vmatmul.mubr.msk.f32.gmra.mrb[12].mxu0 %vm236_vm0, %v232_v14 }
  0x36   : > { %741 = vmatprep.mubr.msk.f32.mxu0 %vm236_vm0, %v233_v15 }
  0x39   : > { %742 = vmatmul.mubr.msk.f32.gmra.mrb[14].mxu0 %vm236_vm0, %v234_v16 }
  0xf0   : > { %v722_v19 = vpop.f32.mrb[0].mxu0 }
  0xf1   : > { %v435_v20 = vmax.f32 %v722_v19, 0.0  ;;  %v355_v21 = vpop.f32.mrb[1].mxu0 }
  0xf2   : > { %v434_v22 = vmax.f32 %v355_v21, 0.0 }
  0xf4   : > { %v725_v23 = vpop.f32.mrb[2].mxu0  ;;  %v780_v24 = vpack.c.bf16 %v435_v20, %v434_v22 }
  0xf5   : > { %v437_v25 = vmax.f32 %v725_v23, 0.0  ;;  %v365_v26 = vpop.f32.mrb[3].mxu0 }
  0xf6   : > { %v436_v27 = vmax.f32 %v365_v26, 0.0  ;;  %781 = vmatpush3.bf16.msra.mxu1 %v780_v24 }
  0xf7   : > { %782 = vmatprep.subr.bf16.mxu1 %v948_v17 }
  0xf8   : > { %v783_v28 = vpack.c.bf16 %v437_v25, %v436_v27  ;;  %v728_v29 = vpop.f32.mrb[4].mxu0 }
  0xf9   : > { %v439_v30 = vmax.f32 %v728_v29, 0.0  ;;  %v375_v31 = vpop.f32.mrb[5].mxu0 }
  0xfa   : > { %v438_v32 = vmax.f32 %v375_v31, 0.0  ;;  %784 = vmatpush3.bf16.msra.mxu1 %v783_v28 }
  0xfb   : > { %785 = vmatprep.subr.bf16.mxu1 %v948_v17 }
  0xfc   : > { %v786_v33 = vpack.c.bf16 %v439_v30, %v438_v32  ;;  %v731_v34 = vpop.f32.mrb[6].mxu0 }
  0xfd   : > { %v441_v35 = vmax.f32 %v731_v34, 0.0  ;;  %v385_v36 = vpop.f32.mrb[7].mxu0 }
  0xfe   : > { %v440_v37 = vmax.f32 %v385_v36, 0.0  ;;  %787 = vmatpush3.bf16.msra.mxu1 %v786_v33 }
  0xff   : > { %788 = vmatprep.subr.bf16.mxu1 %v948_v17 }
 0x100   : > { %v789_v38 = vpack.c.bf16 %v441_v35, %v440_v37  ;;  %v734_v39 = vpop.f32.mrb[8].mxu0 }
 0x101   : > { %v443_v40 = vmax.f32 %v734_v39, 0.0  ;;  %v395_v41 = vpop.f32.mrb[9].mxu0 }
 0x102   : > { %v442_v42 = vmax.f32 %v395_v41, 0.0  ;;  %790 = vmatpush3.bf16.msra.mxu1 %v789_v38 }
 0x103   : > { %791 = vmatprep.subr.bf16.mxu1 %v948_v17 }
 0x104   : > { %v792_v43 = vpack.c.bf16 %v443_v40, %v442_v42  ;;  %v737_v44 = vpop.f32.mrb[10].mxu0 }
 0x105   : > { %v445_v45 = vmax.f32 %v737_v44, 0.0  ;;  %v405_v46 = vpop.f32.mrb[11].mxu0 }
 0x106   : > { %v444_v47 = vmax.f32 %v405_v46, 0.0  ;;  %793 = vmatpush3.bf16.msra.mxu1 %v792_v43 }
 0x107   : > { %794 = vmatprep.subr.bf16.mxu1 %v948_v17 }
 0x108   : > { %v795_v48 = vpack.c.bf16 %v445_v45, %v444_v47  ;;  %v740_v49 = vpop.f32.mrb[12].mxu0 }
 0x109   : > { %v447_v50 = vmax.f32 %v740_v49, 0.0  ;;  %v415_v51 = vpop.f32.mrb[13].mxu0 }
 0x10a   : > { %v446_v52 = vmax.f32 %v415_v51, 0.0  ;;  %796 = vmatpush3.bf16.msra.mxu1 %v795_v48 }
 0x10b   : > { %797 = vmatprep.subr.bf16.mxu1 %v948_v17 }
 0x10c   : > { %v798_v53 = vpack.c.bf16 %v447_v50, %v446_v52  ;;  %v743_v54 = vpop.f32.mrb[14].mxu0 }
 0x10d   : > { %v449_v55 = vmax.f32 %v743_v54, 0.0  ;;  %v425_v56 = vpop.f32.mrb[15].mxu0 }
 0x10e   : > { %v448_v57 = vmax.f32 %v425_v56, 0.0  ;;  %799 = vmatpush3.bf16.msra.mxu1 %v798_v53 }
 0x10f   : > { %800 = vmatprep.subr.bf16.mxu1 %v948_v17 }
 0x110   : > { %v801_v58 = vpack.c.bf16 %v449_v55, %v448_v57 }
 0x112   : > { %802 = vmatpush3.bf16.msra.mxu1 %v801_v58 }
 0x115   : > { %777 = vmatmul.mubr.f32.vlgmr.msra.gmra.mrb[0].mxu1 %v450_v59 }
 0x1e8   : > { %v517_v60 = vpop.f32.mrb[0].mxu1 }
 0x1e9   : > { %v521_v61 = vand.u32 2147483647, %v517_v60  ;;  %v778_v62 = vpop.f32.mrb[1].mxu1  ;;  %v528_v3 = vsub.f32 0.0, %v517_v60 }
 0x1eb   : > { %v522_v63 = vsub.f32 0.0, %v521_v61  ;;  %v529_v6 = vmax.f32 %v528_v3, 0.0 }
 0x1ed   : > { %v523_v0 = vmul.f32 1.442695, %v522_v63 }
 0x1ef   : > { %864 = vpow2.f32 %v523_v0 }
 0x1f9   : > { %v865_v1 = vpop.eup %864 }
 0x1fa   : > { %v525_v2 = vadd.f32 1.0, %v865_v1 }
 0x1fc   : > { %866 = vlog2.f32 %v525_v2 }
 0x206   : > { %v867_v4 = vpop.eup %866 }
 0x207   : > { %v527_v5 = vmul.f32 0.6931472, %v867_v4 }
 0x209   : > { %v530_v7 = vadd.f32 %v529_v6, %v527_v5 }
 0x20b   : > { %v531_v8 = vsub.f32 0.0, %v530_v7 }
 0x20d   : > { %v532_v9 = vsub.f32 %v531_v8, %v517_v60  ;;  %533 = vst [vmem:[%s204_s6] sm:$0xff] %v531_v8 }
 0x20f   : > { %679 = vst [vmem:[%s204_s6 + $0x8] sm:$0xff] %v532_v9 }
 0x210   : > { %881 = shalt.err (!%p878_p5)
}
 0x211   : > { %s882_s26 = scalar_lea.hbm %s1109_s11, 256  ;;  %s886_s29 = scalar_lea.hbm %s1160_s3, 512 }
 0x212   : > { %p883_p6 = scmp.ne.s32.totalorder %s1109_s11, %s882_s26  ;;  %p887_p10 = scmp.lt.u32.totalorder %s1109_s11, %s1160_s3 }
 0x213   : > { %p888_p11 = scmp.lt.u32.totalorder %s886_s29, %s882_s26  ;;  %p890_p13 = scmp.lt.u32.totalorder %s882_s26, %s1109_s11 }
 0x214   : > { %p884_p7 = pnand %p883_p6, %p1015_p4 }
 0x215   : > { %p889_p12 = por %p888_p11, %p887_p10 }
 0x216   : > { %p885_p9 = pneg %p884_p7 }
 0x217   : > { %p891_p0 = por %p890_p13, %p889_p12 }
 0x219   : > { %p892_p1 = pnand %p891_p0, %p885_p9 }
 0x21b   : > { %895 = shalt.err (!%p892_p1)
}
 0x21c   : > { %s952_s5 = smov 128   ;;  %s953_s6 = smov 256  }
 0x21d   : > { %s954_s8 = smov 8  }
 0x21e   : > { %803 = dma.vmem_to_hbm [thread:$0]  (%p1015_p4), %s1104_s7, 256, %s1109_s11, %s1111_s18, %s952_s5, %s953_s6, %s954_s8  }
 0x21f PF: > { %p809_p2 = scmp.ge.s32.totalorder %s946_s17, 2  ;;  %s566_s9 = sand.u32 1, %s926_s12  }
 0x220   : > { %s567_s10 = scalar_lea.sflag [#allocation3], %s566_s9 }
 0x221   : > { %p806_p3 = pnand %p809_p2, %p1022_p8 }
 0x223   : > { %921 = dma.done.wait (!%p806_p3), %s567_s10, 256  }
 0x224   : > { %923 = vsyncadd (!%p806_p3), %s567_s10, 4294967040  ;;  %s16_s17 = sadd.s32 1, %s946_s17   ;;  %s1163_s12 = smov %s930_s13 }
 0x225   : > { %p13_p5 = scmp.ge.s32.totalorder %s16_s17, 4   ;;  %s1164_s13 = smov %s934_s14 }
 0x226   : > { %s1165_s14 = smov %s1028_s25  ;;  %s1166_s15 = smov %s942_s16 }
 0x227   : > { %s1167_s16 = smov %s1169_s20  ;;  %15 = sbr.rel (!%p13_p5) target bundleno = 4 (0x4), region = 74 }
 0x22e   :  { %572 = vsyncpa [#allocation3], 1 }
 0x22f   :  { %574 = vsyncpa [#allocation3 + $0x1], 1 }

</bundles_post_ra>
